<compile_context>
chip_gen: v6e
topology: v6e:2x2x1
jax: 0.10.0
libtpu: 0.0.40
codegen_flags: <defaults>
</compile_context>

<pallas_src>
import functools

import jax
import jax.numpy as jnp
from jax.experimental import pallas as pl
from jax.experimental.pallas import tpu as pltpu


def _hetconv_kernel(xp_ref, w_ref, b_ref, o_ref, *, H, W, Cin, Cout, TB):
    """One grid step == TB images.

    xp_ref: (TB, H+2, W+2, Cin)  zero-padded NHWC input tile
    w_ref:  (9, Cin, Cout)       dense per-tap weights (1x1 conv folded into tap 4)
    b_ref:  (1, Cout)            combined bias (gwc.bias + pwc.bias)
    o_ref:  (TB*H*W, Cout)       output rows, flattened over (tb, h, w), NHWC order
    """
    M = TB * H * W
    acc = jnp.zeros((M, Cout), jnp.float32)
    # 9 kernel taps -> 9 dots, each with a large M (batch+spatial folded) and K=Cin.
    for tap in range(9):
        di, dj = tap // 3, tap % 3
        xs = xp_ref[:, di:di + H, dj:dj + W, :].reshape(M, Cin)
        acc = acc + jnp.dot(xs, w_ref[tap], preferred_element_type=jnp.float32)
    acc = acc + b_ref[...].astype(jnp.float32)          # (1, Cout) broadcasts
    o_ref[...] = acc.astype(o_ref.dtype)


def _grouped_to_dense(w, cin, groups):
    """Grouped-conv weight (Cout, Cin//groups, kh, kw) -> dense (kh, kw, Cin, Cout)."""
    cout, cing, kh, kw = w.shape
    coutg = cout // groups
    ci = jnp.arange(cin)
    co = jnp.arange(cout)
    mask = (ci[:, None] // cing) == (co[None, :] // coutg)       # (Cin, Cout)
    w_t = jnp.transpose(w, (2, 3, 1, 0))                         # (kh, kw, cing, Cout)
    dense = w_t[:, :, ci % cing, :]                              # (kh, kw, Cin, Cout)
    return dense * mask[None, None, :, :].astype(w.dtype)


def hetconv_pallas(x, w_gwc, b_gwc, w_pwc, b_pwc, *, g, p, block_b=None):
    """x: (B, Cin, H, W) NCHW.  Returns (B, Cout, H, W), matching the PyTorch forward."""
    B, Cin, H, W = x.shape
    Cout = w_gwc.shape[0]
    assert w_gwc.shape[2] == 3 and w_gwc.shape[3] == 3, "only kernel_size=3 supported"
    assert w_pwc.shape[2] == 1 and w_pwc.shape[3] == 1

    # Glue (plain JAX): NHWC layout + zero pad of 1 so the kernel is pure matmul.
    x_nhwc = jnp.transpose(x, (0, 2, 3, 1))
    xp = jnp.pad(x_nhwc, ((0, 0), (1, 1), (1, 1), (0, 0)))

    # Dense-equivalent weights; fuse the 1x1 grouped conv into the centre 3x3 tap.
    w3 = _grouped_to_dense(w_gwc, Cin, g).reshape(9, Cin, Cout)
    w1 = _grouped_to_dense(w_pwc, Cin, p)[0, 0]                  # (Cin, Cout)
    w_taps = w3.at[4].add(w1)
    bias = (b_gwc + b_pwc).reshape(1, Cout)

    if block_b is None:
        block_b = 1 if B > 1 else B        # keep >=2 parallel grid steps when possible
    TB = block_b
    assert B % TB == 0, "block_b must divide B"
    M = TB * H * W
    assert M % 8 == 0, "TB*H*W must be a multiple of 8 (sublane alignment)"

    kernel = functools.partial(_hetconv_kernel, H=H, W=W, Cin=Cin, Cout=Cout, TB=TB)

    out2d = pl.pallas_call(
        kernel,
        out_shape=jax.ShapeDtypeStruct((B * H * W, Cout), x.dtype),
        grid_spec=pltpu.PrefetchScalarGridSpec(
            num_scalar_prefetch=0,
            grid=(B // TB,),
            in_specs=[
                pl.BlockSpec((TB, H + 2, W + 2, Cin), lambda b: (b, 0, 0, 0)),
                pl.BlockSpec((9, Cin, Cout), lambda b: (0, 0, 0)),
                pl.BlockSpec((1, Cout), lambda b: (0, 0)),
            ],
            out_specs=pl.BlockSpec((M, Cout), lambda b: (b, 0)),
        ),
        compiler_params=pltpu.CompilerParams(
            dimension_semantics=("parallel",)),
    )(xp, w_taps, bias)

    # (B*H*W, Cout) NHWC-flat -> (B, Cout, H, W) NCHW.
    return out2d.reshape(B, H, W, Cout).transpose(0, 3, 1, 2)


def hetconv_ref(x, w_gwc, b_gwc, w_pwc, b_pwc, *, g, p):
    """Pure-JAX reference matching the PyTorch forward (eval mode)."""
    dn = ('NCHW', 'OIHW', 'NCHW')
    y3 = jax.lax.conv_general_dilated(
        x, w_gwc, window_strides=(1, 1), padding=((1, 1), (1, 1)),
        dimension_numbers=dn, feature_group_count=g,
        precision=jax.lax.Precision.HIGHEST)
    y1 = jax.lax.conv_general_dilated(
        x, w_pwc, window_strides=(1, 1), padding=((0, 0), (0, 0)),
        dimension_numbers=dn, feature_group_count=p,
        precision=jax.lax.Precision.HIGHEST)
    return y3 + b_gwc.reshape(1, -1, 1, 1) + y1 + b_pwc.reshape(1, -1, 1, 1)


if __name__ == "__main__":
    # Small shapes consistent with the module (channels divisible by both g and p).
    B, Cin, Cout, H, W = 2, 16, 32, 8, 8
    g, p = 4, 4

    key = jax.random.PRNGKey(0)
    kx, k1, k2, k3, k4 = jax.random.split(key, 5)

    x = jax.random.normal(kx, (B, Cin, H, W), dtype=jnp.float32)

    def uinit(k, shape, fan_in):
        bound = 1.0 / (fan_in ** 0.5)
        return jax.random.uniform(k, shape, jnp.float32, -bound, bound)

    # PyTorch Conv2d layout: weight = (out, in/groups, kh, kw); bias=True by default.
    w_gwc = uinit(k1, (Cout, Cin // g, 3, 3), (Cin // g) * 9)
    b_gwc = uinit(k2, (Cout,), (Cin // g) * 9)
    w_pwc = uinit(k3, (Cout, Cin // p, 1, 1), (Cin // p))
    b_pwc = uinit(k4, (Cout,), (Cin // p))

    out = hetconv_pallas(x, w_gwc, b_gwc, w_pwc, b_pwc, g=g, p=p)
    out = jax.block_until_ready(out)

    ref = hetconv_ref(x, w_gwc, b_gwc, w_pwc, b_pwc, g=g, p=p)
    assert out.shape == (B, Cout, H, W), out.shape
    max_err = float(jnp.max(jnp.abs(out - ref)))
    assert jnp.allclose(out, ref, atol=1e-4, rtol=1e-4), max_err

    print("KERNEL_OK")
</pallas_src>

<mosaic_0001>
module attributes {stable_mosaic.version = 11 : i64} {
  func.func @_hetconv_kernel(%arg0: i32, %arg1: memref<1x10x10x16xf32, #tpu.memory_space<vmem>>, %arg2: memref<9x16x32xf32, #tpu.memory_space<vmem>>, %arg3: memref<1x32xf32, #tpu.memory_space<vmem>>, %arg4: memref<64x32xf32, #tpu.memory_space<vmem>>) attributes {dimension_semantics = [#tpu.dimension_semantics<parallel>], iteration_bounds = array<i64: 2>, scalar_prefetch = 0 : i64, scratch_operands = 0 : i64, tpu.core_type = #tpu.core_type<tc>, window_params = [{transform_indices = @transform_0, window_bounds = array<i64: 1, 10, 10, 16>}, {pipeline_mode = #tpu.pipeline_mode<synchronous>, transform_indices = @transform_1, window_bounds = array<i64: 9, 16, 32>}, {pipeline_mode = #tpu.pipeline_mode<synchronous>, transform_indices = @transform_2, window_bounds = array<i64: 1, 32>}, {transform_indices = @transform_3, window_bounds = array<i64: 64, 32>}]} {
    %cst = arith.constant 0.000000e+00 : f32
    %0 = vector.broadcast %cst : f32 to vector<64x32xf32>
    %c0 = arith.constant 0 : index
    %c0_0 = arith.constant 0 : index
    %c0_1 = arith.constant 0 : index
    %c0_2 = arith.constant 0 : index
    %1 = vector.load %arg1[%c0, %c0_0, %c0_1, %c0_2] : memref<1x10x10x16xf32, #tpu.memory_space<vmem>>, vector<1x8x8x16xf32>
    %2 = vector.shape_cast %1 : vector<1x8x8x16xf32> to vector<64x16xf32>
    %c0_3 = arith.constant 0 : index
    %c0_4 = arith.constant 0 : index
    %c0_5 = arith.constant 0 : index
    %3 = vector.load %arg2[%c0_3, %c0_4, %c0_5] : memref<9x16x32xf32, #tpu.memory_space<vmem>>, vector<1x16x32xf32>
    %4 = vector.shape_cast %3 : vector<1x16x32xf32> to vector<16x32xf32>
    %cst_6 = arith.constant dense<0.000000e+00> : vector<64x32xf32>
    %5 = tpu.matmul %2, %4, %cst_6 {dimension_numbers = #tpu.dot_dimension_numbers<[1], [0], [0], [1], [0, 0, 1, 1], [], []>} : vector<64x16xf32>, vector<16x32xf32>, vector<64x32xf32> -> vector<64x32xf32>
    %6 = arith.addf %0, %5 : vector<64x32xf32>
    %c0_7 = arith.constant 0 : index
    %c0_8 = arith.constant 0 : index
    %c1 = arith.constant 1 : index
    %c0_9 = arith.constant 0 : index
    %7 = vector.load %arg1[%c0_7, %c0_8, %c1, %c0_9] : memref<1x10x10x16xf32, #tpu.memory_space<vmem>>, vector<1x8x8x16xf32>
    %8 = vector.shape_cast %7 : vector<1x8x8x16xf32> to vector<64x16xf32>
    %c1_10 = arith.constant 1 : index
    %c0_11 = arith.constant 0 : index
    %c0_12 = arith.constant 0 : index
    %9 = vector.load %arg2[%c1_10, %c0_11, %c0_12] : memref<9x16x32xf32, #tpu.memory_space<vmem>>, vector<1x16x32xf32>
    %10 = vector.shape_cast %9 : vector<1x16x32xf32> to vector<16x32xf32>
    %cst_13 = arith.constant dense<0.000000e+00> : vector<64x32xf32>
    %11 = tpu.matmul %8, %10, %cst_13 {dimension_numbers = #tpu.dot_dimension_numbers<[1], [0], [0], [1], [0, 0, 1, 1], [], []>} : vector<64x16xf32>, vector<16x32xf32>, vector<64x32xf32> -> vector<64x32xf32>
    %12 = arith.addf %6, %11 : vector<64x32xf32>
    %c0_14 = arith.constant 0 : index
    %c0_15 = arith.constant 0 : index
    %c2 = arith.constant 2 : index
    %c0_16 = arith.constant 0 : index
    %13 = vector.load %arg1[%c0_14, %c0_15, %c2, %c0_16] : memref<1x10x10x16xf32, #tpu.memory_space<vmem>>, vector<1x8x8x16xf32>
    %14 = vector.shape_cast %13 : vector<1x8x8x16xf32> to vector<64x16xf32>
    %c2_17 = arith.constant 2 : index
    %c0_18 = arith.constant 0 : index
    %c0_19 = arith.constant 0 : index
    %15 = vector.load %arg2[%c2_17, %c0_18, %c0_19] : memref<9x16x32xf32, #tpu.memory_space<vmem>>, vector<1x16x32xf32>
    %16 = vector.shape_cast %15 : vector<1x16x32xf32> to vector<16x32xf32>
    %cst_20 = arith.constant dense<0.000000e+00> : vector<64x32xf32>
    %17 = tpu.matmul %14, %16, %cst_20 {dimension_numbers = #tpu.dot_dimension_numbers<[1], [0], [0], [1], [0, 0, 1, 1], [], []>} : vector<64x16xf32>, vector<16x32xf32>, vector<64x32xf32> -> vector<64x32xf32>
    %18 = arith.addf %12, %17 : vector<64x32xf32>
    %c0_21 = arith.constant 0 : index
    %c1_22 = arith.constant 1 : index
    %c0_23 = arith.constant 0 : index
    %c0_24 = arith.constant 0 : index
    %19 = vector.load %arg1[%c0_21, %c1_22, %c0_23, %c0_24] : memref<1x10x10x16xf32, #tpu.memory_space<vmem>>, vector<1x8x8x16xf32>
    %20 = vector.shape_cast %19 : vector<1x8x8x16xf32> to vector<64x16xf32>
    %c3 = arith.constant 3 : index
    %c0_25 = arith.constant 0 : index
    %c0_26 = arith.constant 0 : index
    %21 = vector.load %arg2[%c3, %c0_25, %c0_26] : memref<9x16x32xf32, #tpu.memory_space<vmem>>, vector<1x16x32xf32>
    %22 = vector.shape_cast %21 : vector<1x16x32xf32> to vector<16x32xf32>
    %cst_27 = arith.constant dense<0.000000e+00> : vector<64x32xf32>
    %23 = tpu.matmul %20, %22, %cst_27 {dimension_numbers = #tpu.dot_dimension_numbers<[1], [0], [0], [1], [0, 0, 1, 1], [], []>} : vector<64x16xf32>, vector<16x32xf32>, vector<64x32xf32> -> vector<64x32xf32>
    %24 = arith.addf %18, %23 : vector<64x32xf32>
    %c0_28 = arith.constant 0 : index
    %c1_29 = arith.constant 1 : index
    %c1_30 = arith.constant 1 : index
    %c0_31 = arith.constant 0 : index
    %25 = vector.load %arg1[%c0_28, %c1_29, %c1_30, %c0_31] : memref<1x10x10x16xf32, #tpu.memory_space<vmem>>, vector<1x8x8x16xf32>
    %26 = vector.shape_cast %25 : vector<1x8x8x16xf32> to vector<64x16xf32>
    %c4 = arith.constant 4 : index
    %c0_32 = arith.constant 0 : index
    %c0_33 = arith.constant 0 : index
    %27 = vector.load %arg2[%c4, %c0_32, %c0_33] : memref<9x16x32xf32, #tpu.memory_space<vmem>>, vector<1x16x32xf32>
    %28 = vector.shape_cast %27 : vector<1x16x32xf32> to vector<16x32xf32>
    %cst_34 = arith.constant dense<0.000000e+00> : vector<64x32xf32>
    %29 = tpu.matmul %26, %28, %cst_34 {dimension_numbers = #tpu.dot_dimension_numbers<[1], [0], [0], [1], [0, 0, 1, 1], [], []>} : vector<64x16xf32>, vector<16x32xf32>, vector<64x32xf32> -> vector<64x32xf32>
    %30 = arith.addf %24, %29 : vector<64x32xf32>
    %c0_35 = arith.constant 0 : index
    %c1_36 = arith.constant 1 : index
    %c2_37 = arith.constant 2 : index
    %c0_38 = arith.constant 0 : index
    %31 = vector.load %arg1[%c0_35, %c1_36, %c2_37, %c0_38] : memref<1x10x10x16xf32, #tpu.memory_space<vmem>>, vector<1x8x8x16xf32>
    %32 = vector.shape_cast %31 : vector<1x8x8x16xf32> to vector<64x16xf32>
    %c5 = arith.constant 5 : index
    %c0_39 = arith.constant 0 : index
    %c0_40 = arith.constant 0 : index
    %33 = vector.load %arg2[%c5, %c0_39, %c0_40] : memref<9x16x32xf32, #tpu.memory_space<vmem>>, vector<1x16x32xf32>
    %34 = vector.shape_cast %33 : vector<1x16x32xf32> to vector<16x32xf32>
    %cst_41 = arith.constant dense<0.000000e+00> : vector<64x32xf32>
    %35 = tpu.matmul %32, %34, %cst_41 {dimension_numbers = #tpu.dot_dimension_numbers<[1], [0], [0], [1], [0, 0, 1, 1], [], []>} : vector<64x16xf32>, vector<16x32xf32>, vector<64x32xf32> -> vector<64x32xf32>
    %36 = arith.addf %30, %35 : vector<64x32xf32>
    %c0_42 = arith.constant 0 : index
    %c2_43 = arith.constant 2 : index
    %c0_44 = arith.constant 0 : index
    %c0_45 = arith.constant 0 : index
    %37 = vector.load %arg1[%c0_42, %c2_43, %c0_44, %c0_45] : memref<1x10x10x16xf32, #tpu.memory_space<vmem>>, vector<1x8x8x16xf32>
    %38 = vector.shape_cast %37 : vector<1x8x8x16xf32> to vector<64x16xf32>
    %c6 = arith.constant 6 : index
    %c0_46 = arith.constant 0 : index
    %c0_47 = arith.constant 0 : index
    %39 = vector.load %arg2[%c6, %c0_46, %c0_47] : memref<9x16x32xf32, #tpu.memory_space<vmem>>, vector<1x16x32xf32>
    %40 = vector.shape_cast %39 : vector<1x16x32xf32> to vector<16x32xf32>
    %cst_48 = arith.constant dense<0.000000e+00> : vector<64x32xf32>
    %41 = tpu.matmul %38, %40, %cst_48 {dimension_numbers = #tpu.dot_dimension_numbers<[1], [0], [0], [1], [0, 0, 1, 1], [], []>} : vector<64x16xf32>, vector<16x32xf32>, vector<64x32xf32> -> vector<64x32xf32>
    %42 = arith.addf %36, %41 : vector<64x32xf32>
    %c0_49 = arith.constant 0 : index
    %c2_50 = arith.constant 2 : index
    %c1_51 = arith.constant 1 : index
    %c0_52 = arith.constant 0 : index
    %43 = vector.load %arg1[%c0_49, %c2_50, %c1_51, %c0_52] : memref<1x10x10x16xf32, #tpu.memory_space<vmem>>, vector<1x8x8x16xf32>
    %44 = vector.shape_cast %43 : vector<1x8x8x16xf32> to vector<64x16xf32>
    %c7 = arith.constant 7 : index
    %c0_53 = arith.constant 0 : index
    %c0_54 = arith.constant 0 : index
    %45 = vector.load %arg2[%c7, %c0_53, %c0_54] : memref<9x16x32xf32, #tpu.memory_space<vmem>>, vector<1x16x32xf32>
    %46 = vector.shape_cast %45 : vector<1x16x32xf32> to vector<16x32xf32>
    %cst_55 = arith.constant dense<0.000000e+00> : vector<64x32xf32>
    %47 = tpu.matmul %44, %46, %cst_55 {dimension_numbers = #tpu.dot_dimension_numbers<[1], [0], [0], [1], [0, 0, 1, 1], [], []>} : vector<64x16xf32>, vector<16x32xf32>, vector<64x32xf32> -> vector<64x32xf32>
    %48 = arith.addf %42, %47 : vector<64x32xf32>
    %c0_56 = arith.constant 0 : index
    %c2_57 = arith.constant 2 : index
    %c2_58 = arith.constant 2 : index
    %c0_59 = arith.constant 0 : index
    %49 = vector.load %arg1[%c0_56, %c2_57, %c2_58, %c0_59] : memref<1x10x10x16xf32, #tpu.memory_space<vmem>>, vector<1x8x8x16xf32>
    %50 = vector.shape_cast %49 : vector<1x8x8x16xf32> to vector<64x16xf32>
    %c8 = arith.constant 8 : index
    %c0_60 = arith.constant 0 : index
    %c0_61 = arith.constant 0 : index
    %51 = vector.load %arg2[%c8, %c0_60, %c0_61] : memref<9x16x32xf32, #tpu.memory_space<vmem>>, vector<1x16x32xf32>
    %52 = vector.shape_cast %51 : vector<1x16x32xf32> to vector<16x32xf32>
    %cst_62 = arith.constant dense<0.000000e+00> : vector<64x32xf32>
    %53 = tpu.matmul %50, %52, %cst_62 {dimension_numbers = #tpu.dot_dimension_numbers<[1], [0], [0], [1], [0, 0, 1, 1], [], []>} : vector<64x16xf32>, vector<16x32xf32>, vector<64x32xf32> -> vector<64x32xf32>
    %54 = arith.addf %48, %53 : vector<64x32xf32>
    %c0_63 = arith.constant 0 : index
    %c0_64 = arith.constant 0 : index
    %55 = vector.load %arg3[%c0_63, %c0_64] : memref<1x32xf32, #tpu.memory_space<vmem>>, vector<1x32xf32>
    %56 = vector.broadcast %55 : vector<1x32xf32> to vector<64x32xf32>
    %57 = arith.addf %54, %56 : vector<64x32xf32>
    %c0_65 = arith.constant 0 : index
    %c0_66 = arith.constant 0 : index
    %58 = vector.load %arg4[%c0_65, %c0_66] : memref<64x32xf32, #tpu.memory_space<vmem>>, vector<64x32xf32>
    tpu.vector_store %arg4[%c0_65, %c0_66], %57 {strides = array<i32>} : memref<64x32xf32, #tpu.memory_space<vmem>>, vector<64x32xf32>,
    return
  }
  func.func @transform_0(%arg0: i32) -> (i32, i32, i32, i32) {
    %c0_i32 = arith.constant 0 : i32
    %c0_i32_0 = arith.constant 0 : i32
    %c0_i32_1 = arith.constant 0 : i32
    %c0_i32_2 = arith.constant 0 : i32
    return %arg0, %c0_i32, %c0_i32_0, %c0_i32_1 : i32, i32, i32, i32
  }
  func.func @transform_1(%arg0: i32) -> (i32, i32, i32) {
    %c0_i32 = arith.constant 0 : i32
    %c0_i32_0 = arith.constant 0 : i32
    %c0_i32_1 = arith.constant 0 : i32
    %c0_i32_2 = arith.constant 0 : i32
    return %c0_i32, %c0_i32_0, %c0_i32_1 : i32, i32, i32
  }
  func.func @transform_2(%arg0: i32) -> (i32, i32) {
    %c0_i32 = arith.constant 0 : i32
    %c0_i32_0 = arith.constant 0 : i32
    %c0_i32_1 = arith.constant 0 : i32
    return %c0_i32, %c0_i32_0 : i32, i32
  }
  func.func @transform_3(%arg0: i32) -> (i32, i32) {
    %c0_i32 = arith.constant 0 : i32
    %c0_i32_0 = arith.constant 0 : i32
    return %arg0, %c0_i32 : i32, i32
  }
}

</mosaic_0001>

<bundles_post_ra>
// kernel: tpu_custom_call.1
= control target key start
LH: loop header
LB: loop body
LE: loop exit
PB: predicated region body
PF: predicated region fallthrough
CT: control target
= control target key end

     0   :  { %s1992_s12 = smov 0   ;;  %s2297_s0 = inlined_call_operand.vmem [shape: f32[2,10,10,16], index: 0, kind: input, shape index: {}]   ;;  %s2298_s1 = inlined_call_operand.vmem [shape: f32[9,16,32], index: 1, kind: input, shape index: {}]   ;;  %s2299_s2 = inlined_call_operand.vmem [shape: f32[1,32], index: 2, kind: input, shape index: {}]   ;;  %s2300_s3 = inlined_call_operand.vmem [shape: f32[128,32], index: 3, kind: output, shape index: {}]  }
   0x1 LB: > { %s1998_s13 = sadd.s32 4294967295, %s1970_s12   ;;  %p1574_p0 = scmp.ge.s32.totalorder %s1970_s12, 1  ;;  %s1970_s12 = sphi %s1992_s12, %s13_s12  }
   0x2   : > { %p137_p1 = scmp.lt.s32.totalorder %s1970_s12, 3 }
   0x4   : > { %p138_p2 = pnand %p1574_p0, %p137_p1 }
   0x5   : > { %p161_p3 = scmp.lt.s32.totalorder (!%p138_p2), %s1998_s13, 1 }
   0x6   : > { %141 = sbr.rel (%p138_p2) target bundleno = 289 (0x121), region = 32 }
   0xb   : > { %v1579_v0 = vld [vmem:[%s2298_s1 + $0x18] sm:$0xff]  ;;  %v1578_v1 = vld [vmem:[%s2298_s1 + $0x10] sm:$0xff]  ;;  %s162_s18 = scalar_select %p161_p3, %s1998_s13, 1  ;;  %v181_v2 = vld [vmem:[%s2298_s1 + $0x8] sm:$0xff]  ;;  %vm193_vm0 = vcmask 130048   ;;  %vm1505_vm1 = vcmask 261120  }
   0xc   : > { %1951 = vmatprep.subr.mxu1 %v1579_v0  ;;  %1807 = vmatprep.subr.mxu0 %v1579_v0  ;;  %v1597_v3 = vld [vmem:[%s2298_s1 + $0x28] sm:$0xff]  ;;  %v180_v10 = vld [vmem:[%s2298_s1] sm:$0xff]  ;;  %v1615_v16 = vld [vmem:[%s2298_s1 + $0x38] sm:$0xff] }
   0xd   : > { %1953 = vmatpush3.msra.mxu1 %v1579_v0  ;;  %1808 = vmatpush3.msra.mxu0 %v1579_v0  ;;  %s1955_s23 = smul.u32 160, %s162_s18  ;;  %v1596_v11 = vld [vmem:[%s2298_s1 + $0x20] sm:$0xff]  ;;  %v1633_v17 = vld [vmem:[%s2298_s1 + $0x48] sm:$0xff]  ;;  %v1614_v22 = vld [vmem:[%s2298_s1 + $0x30] sm:$0xff] }
   0xe   : > { %1952 = vmatprep.subr.mxu1 %v1578_v1  ;;  %1809 = vmatprep.subr.mxu0 %v1578_v1  ;;  %v1632_v23 = vld [vmem:[%s2298_s1 + $0x40] sm:$0xff]  ;;  %v1651_v28 = vld [vmem:[%s2298_s1 + $0x58] sm:$0xff]  ;;  %v1669_v29 = vld [vmem:[%s2298_s1 + $0x68] sm:$0xff] }
   0xf   : > { %1954 = vmatpush3.msra.mxu1 %v1578_v1  ;;  %1810 = vmatpush3.msra.mxu0 %v1578_v1  ;;  %s2019_s26 = scalar_lea.vmem %s2297_s0, %s1955_s23  ;;  %v1650_v36 = vld [vmem:[%s2298_s1 + $0x50] sm:$0xff]  ;;  %v1668_v37 = vld [vmem:[%s2298_s1 + $0x60] sm:$0xff]  ;;  %v1687_v38 = vld [vmem:[%s2298_s1 + $0x78] sm:$0xff] }
  0x10   : > { %1823 = vmatprep.subr.mxu1 %v181_v2  ;;  %1839 = vmatprep.subr.mxu0 %v1597_v3  ;;  %v182_v4 = vld [vmem:[%s2019_s26 + $0x1] sm:$0xff]  ;;  %v2026_v6 = vld [vmem:[%s2019_s26 + $0x11] sm:$0xff] }
  0x11   : > { %v2023_v5 = vld [vmem:[%s2019_s26 + $0x41] sm:$0xff]  ;;  %1811 = vmatprep.mubr.msk.f32.mxu0 %vm193_vm0, %v182_v4  ;;  %v2032_v7 = vld [vmem:[%s2019_s26 + $0x51] sm:$0xff] }
  0x12   : > { %1817 = vmatprep.mubr.msk.f32.mxu1 %vm193_vm0, %v2023_v5  ;;  %v2035_v8 = vld [vmem:[%s2019_s26 + $0x21] sm:$0xff]  ;;  %1812 = vmatmul.mubr.msk.f32.vlgmr.msra.gmra.mxu0 %vm193_vm0, %v2026_v6  ;;  %v2051_v12 = vld [vmem:[%s2019_s26 + $0x31] sm:$0xff] }
  0x13   : > { %v2038_v9 = vld [vmem:[%s2019_s26 + $0x61] sm:$0xff]  ;;  %1818 = vmatmul.mubr.msk.f32.vlgmr.msra.gmra.mxu1 %vm193_vm0, %v2032_v7  ;;  %1840 = vmatpush3.msra.mxu0 %v1597_v3  ;;  %v2054_v13 = vld [vmem:[%s2019_s26 + $0x71] sm:$0xff] }
  0x14   : > { %1824 = vmatpush3.msra.mxu1 %v181_v2  ;;  %1814 = vmatprep.mubr.msk.f32.mxu0 %vm193_vm0, %v2035_v8  ;;  %v172_v14 = vld [vmem:[%s2019_s26] sm:$0xff]  ;;  %v173_v18 = vld [vmem:[%s2019_s26 + $0x10] sm:$0xff]  ;;  %v1705_v39 = vld [vmem:[%s2298_s1 + $0x88] sm:$0xff] }
  0x15   : > { %1820 = vmatprep.mubr.msk.f32.mxu1 %vm193_vm0, %v2038_v9  ;;  %1825 = vmatprep.subr.mxu1 %v180_v10  ;;  %v452_v15 = vld [vmem:[%s2019_s26 + $0x2] sm:$0xff]  ;;  %v2074_v19 = vld [vmem:[%s2019_s26 + $0x12] sm:$0xff] }
  0x16   : > { %1841 = vmatprep.subr.mxu0 %v1596_v11  ;;  %1815 = vmatmul.mubr.msk.f32.gmra.mxu0 %vm193_vm0, %v2051_v12  ;;  %v2079_v20 = vld [vmem:[%s2019_s26 + $0x20] sm:$0xff]  ;;  %v2094_v24 = vld [vmem:[%s2019_s26 + $0x30] sm:$0xff] }
  0x17   : > { %1821 = vmatmul.mubr.msk.f32.gmra.mxu1 %vm193_vm0, %v2054_v13  ;;  %1842 = vmatpush3.msra.mxu0 %v1596_v11  ;;  %v2082_v21 = vld [vmem:[%s2019_s26 + $0x22] sm:$0xff]  ;;  %v2097_v25 = vld [vmem:[%s2019_s26 + $0x32] sm:$0xff] }
  0x18   : > { %1826 = vmatpush3.msra.mxu1 %v180_v10  ;;  %1827 = vmatprep.mubr.msk.f32.mxu1 %vm193_vm0, %v172_v14  ;;  %v2104_v26 = vld [vmem:[%s2019_s26 + $0x40] sm:$0xff]  ;;  %v177_v30 = vld [vmem:[%s2019_s26 + $0x50] sm:$0xff] }
  0x19   : > { %1843 = vmatprep.mubr.msk.f32.mxu0 %vm193_vm0, %v452_v15  ;;  %1855 = vmatprep.subr.mxu1 %v1615_v16  ;;  %v2107_v27 = vld [vmem:[%s2019_s26 + $0x42] sm:$0xff]  ;;  %v2125_v31 = vld [vmem:[%s2019_s26 + $0x52] sm:$0xff] }
  0x1a   : > { %1871 = vmatprep.subr.mxu0 %v1633_v17  ;;  %1844 = vmatmul.mubr.msk.f32.vlgmr.msra.gmra.mxu0 %vm193_vm0, %v2074_v19  ;;  %v178_v32 = vld [vmem:[%s2019_s26 + $0x60] sm:$0xff]  ;;  %v179_v34 = vld [vmem:[%s2019_s26 + $0x70] sm:$0xff] }
  0x1b   : > { %1828 = vmatmul.mubr.msk.f32.vlgmr.msra.gmra.mxu1 %vm193_vm0, %v173_v18  ;;  %1872 = vmatpush3.msra.mxu0 %v1633_v17  ;;  %v2129_v33 = vld [vmem:[%s2019_s26 + $0x62] sm:$0xff]  ;;  %v2139_v35 = vld [vmem:[%s2019_s26 + $0x72] sm:$0xff] }
  0x1c   : > { %1856 = vmatpush3.msra.mxu1 %v1615_v16  ;;  %1830 = vmatprep.mubr.msk.f32.mxu1 %vm193_vm0, %v2079_v20  ;;  %v1613_v40 = vld [vmem:[%s2019_s26 + $0x80] sm:$0xff]  ;;  %v1686_v42 = vld [vmem:[%s2298_s1 + $0x70] sm:$0xff] }
  0x1d   : > { %1846 = vmatprep.mubr.msk.f32.mxu0 %vm193_vm0, %v2082_v21  ;;  %1857 = vmatprep.subr.mxu1 %v1614_v22  ;;  %v1631_v41 = vld [vmem:[%s2019_s26 + $0x81] sm:$0xff]  ;;  %v1667_v45 = vld [vmem:[%s2019_s26 + $0x90] sm:$0xff] }
  0x1e   : > { %1873 = vmatprep.subr.mxu0 %v1632_v23  ;;  %1847 = vmatmul.mubr.msk.f32.gmra.mxu0 %vm193_vm0, %v2097_v25  ;;  %v1704_v43 = vld [vmem:[%s2298_s1 + $0x80] sm:$0xff]  ;;  %v1685_v46 = vld [vmem:[%s2019_s26 + $0x91] sm:$0xff] }
  0x1f   : > { %1831 = vmatmul.mubr.msk.f32.gmra.mxu1 %vm193_vm0, %v2094_v24  ;;  %1849 = vmatprep.mubr.msk.f32.mxu0 %vm193_vm0, %v2107_v27  ;;  %v1649_v44 = vld [vmem:[%s2019_s26 + $0x82] sm:$0xff]  ;;  %v1703_v47 = vld [vmem:[%s2019_s26 + $0x92] sm:$0xff]  ;;  %s1576_s26 = sshll.u32 %s1998_s13, 3 }
  0x20   : > { %1833 = vmatprep.mubr.msk.f32.mxu1 %vm193_vm0, %v2104_v26  ;;  %1858 = vmatpush3.msra.mxu1 %v1614_v22  ;;  %p2257_p4 = scmp.lt.s32.totalorder %s1576_s26, 15 }
  0x21   : > { %1874 = vmatpush3.msra.mxu0 %v1632_v23  ;;  %1887 = vmatprep.subr.mxu1 %v1651_v28 }
  0x22   : > { %1903 = vmatprep.subr.mxu0 %v1669_v29  ;;  %1850 = vmatmul.mubr.msk.f32.gmra.mxu0 %vm193_vm0, %v2125_v31  ;;  %s2303_s26 = smov (!%p2257_p4, %s1576_s26), 15 }
  0x23   : > { %1834 = vmatmul.mubr.msk.f32.gmra.mxu1 %vm193_vm0, %v177_v30  ;;  %1852 = vmatprep.mubr.msk.f32.mxu0 %vm193_vm0, %v2129_v33  ;;  %s1577_s13 = sshll.u32 %s2303_s26, 3 }
  0x24   : > { %1836 = vmatprep.mubr.msk.f32.mxu1 %vm193_vm0, %v178_v32  ;;  %s2275_s9 = scalar_lea.vmem %s2300_s3, %s1577_s13 }
  0x26   : > { %1853 = vmatmul.mubr.msk.f32.gmra.mxu0 %vm193_vm0, %v2139_v35 }
  0x27   : > { %1837 = vmatmul.mubr.msk.f32.gmra.mxu1 %vm193_vm0, %v179_v34  ;;  %1875 = vmatprep.mubr.msk.f32.mxu0 %vm193_vm0, %v2026_v6 }
  0x28   : > { %1859 = vmatprep.mubr.msk.f32.mxu1 %vm193_vm0, %v173_v18 }
  0x2a   : > { %1876 = vmatmul.mubr.msk.f32.vlgmr.msra.gmra.mxu0 %vm193_vm0, %v2035_v8 }
  0x2b   : > { %1860 = vmatmul.mubr.msk.f32.vlgmr.msra.gmra.mxu1 %vm193_vm0, %v2079_v20  ;;  %1904 = vmatpush3.msra.mxu0 %v1669_v29 }
  0x2c   : > { %1888 = vmatpush3.msra.mxu1 %v1651_v28  ;;  %1862 = vmatprep.mubr.msk.f32.mxu1 %vm193_vm0, %v2094_v24 }
  0x2d   : > { %1878 = vmatprep.mubr.msk.f32.mxu0 %vm193_vm0, %v2051_v12  ;;  %1889 = vmatprep.subr.mxu1 %v1650_v36 }
  0x2e   : > { %1905 = vmatprep.subr.mxu0 %v1668_v37  ;;  %1879 = vmatmul.mubr.msk.f32.gmra.mxu0 %vm193_vm0, %v2023_v5 }
  0x2f   : > { %1863 = vmatmul.mubr.msk.f32.gmra.mxu1 %vm193_vm0, %v2104_v26  ;;  %1881 = vmatprep.mubr.msk.f32.mxu0 %vm193_vm0, %v2032_v7 }
  0x30   : > { %1865 = vmatprep.mubr.msk.f32.mxu1 %vm193_vm0, %v177_v30  ;;  %1890 = vmatpush3.msra.mxu1 %v1650_v36 }
  0x31   : > { %1906 = vmatpush3.msra.mxu0 %v1668_v37  ;;  %1919 = vmatprep.subr.mxu1 %v1687_v38 }
  0x32   : > { %1935 = vmatprep.subr.mxu0 %v1705_v39  ;;  %1882 = vmatmul.mubr.msk.f32.gmra.mxu0 %vm193_vm0, %v2038_v9 }
  0x33   : > { %1866 = vmatmul.mubr.msk.f32.gmra.mxu1 %vm193_vm0, %v178_v32  ;;  %1884 = vmatprep.mubr.msk.f32.mxu0 %vm193_vm0, %v2054_v13 }
  0x34   : > { %1868 = vmatprep.mubr.msk.f32.mxu1 %vm193_vm0, %v179_v34 }
  0x36   : > { %1885 = vmatmul.mubr.msk.f32.gmra.mxu0 %vm193_vm0, %v1631_v41 }
  0x37   : > { %1869 = vmatmul.mubr.msk.f32.gmra.mxu1 %vm193_vm0, %v1613_v40  ;;  %1907 = vmatprep.mubr.msk.f32.mxu0 %vm193_vm0, %v2079_v20 }
  0x38   : > { %1891 = vmatprep.mubr.msk.f32.mxu1 %vm193_vm0, %v2074_v19 }
  0x3a   : > { %1908 = vmatmul.mubr.msk.f32.vlgmr.msra.gmra.mxu0 %vm193_vm0, %v2094_v24 }
  0x3b   : > { %1892 = vmatmul.mubr.msk.f32.vlgmr.msra.gmra.mxu1 %vm193_vm0, %v2082_v21  ;;  %1936 = vmatpush3.msra.mxu0 %v1705_v39 }
  0x3c   : > { %1920 = vmatpush3.msra.mxu1 %v1687_v38  ;;  %1894 = vmatprep.mubr.msk.f32.mxu1 %vm193_vm0, %v2097_v25 }
  0x3d   : > { %1910 = vmatprep.mubr.msk.f32.mxu0 %vm193_vm0, %v2104_v26  ;;  %1921 = vmatprep.subr.mxu1 %v1686_v42 }
  0x3e   : > { %1937 = vmatprep.subr.mxu0 %v1704_v43  ;;  %1911 = vmatmul.mubr.msk.f32.gmra.mxu0 %vm193_vm0, %v177_v30 }
  0x3f   : > { %1895 = vmatmul.mubr.msk.f32.gmra.mxu1 %vm193_vm0, %v2107_v27  ;;  %1913 = vmatprep.mubr.msk.f32.mxu0 %vm193_vm0, %v178_v32 }
  0x40   : > { %1897 = vmatprep.mubr.msk.f32.mxu1 %vm193_vm0, %v2125_v31  ;;  %1922 = vmatpush3.msra.mxu1 %v1686_v42 }
  0x41   : > { %1938 = vmatpush3.msra.mxu0 %v1704_v43 }
  0x42   : > { %1914 = vmatmul.mubr.msk.f32.gmra.mxu0 %vm193_vm0, %v179_v34 }
  0x43   : > { %1898 = vmatmul.mubr.msk.f32.gmra.mxu1 %vm193_vm0, %v2129_v33  ;;  %1916 = vmatprep.mubr.msk.f32.mxu0 %vm193_vm0, %v1613_v40 }
  0x44   : > { %1900 = vmatprep.mubr.msk.f32.mxu1 %vm193_vm0, %v2139_v35 }
  0x46   : > { %1917 = vmatmul.mubr.msk.f32.gmra.mxu0 %vm193_vm0, %v1667_v45 }
  0x47   : > { %1901 = vmatmul.mubr.msk.f32.gmra.mxu1 %vm193_vm0, %v1649_v44  ;;  %1939 = vmatprep.mubr.msk.f32.mxu0 %vm193_vm0, %v2082_v21 }
  0x48   : > { %1923 = vmatprep.mubr.msk.f32.mxu1 %vm193_vm0, %v2035_v8 }
  0x4a   : > { %1940 = vmatmul.mubr.msk.f32.vlgmr.msra.gmra.mxu0 %vm193_vm0, %v2097_v25 }
  0x4b   : > { %1924 = vmatmul.mubr.msk.f32.vlgmr.msra.gmra.mxu1 %vm193_vm0, %v2051_v12  ;;  %1942 = vmatprep.mubr.msk.f32.mxu0 %vm193_vm0, %v2107_v27 }
  0x4c   : > { %1926 = vmatprep.mubr.msk.f32.mxu1 %vm193_vm0, %v2023_v5 }
  0x4e   : > { %1943 = vmatmul.mubr.msk.f32.gmra.mxu0 %vm193_vm0, %v2125_v31 }
  0x4f   : > { %1927 = vmatmul.mubr.msk.f32.gmra.mxu1 %vm193_vm0, %v2032_v7  ;;  %1945 = vmatprep.mubr.msk.f32.mxu0 %vm193_vm0, %v2129_v33 }
  0x50   : > { %1929 = vmatprep.mubr.msk.f32.mxu1 %vm193_vm0, %v2038_v9 }
  0x52   : > { %1946 = vmatmul.mubr.msk.f32.gmra.mxu0 %vm193_vm0, %v2139_v35 }
  0x53   : > { %1930 = vmatmul.mubr.msk.f32.gmra.mxu1 %vm193_vm0, %v2054_v13  ;;  %1948 = vmatprep.mubr.msk.f32.mxu0 %vm193_vm0, %v1649_v44 }
  0x54   : > { %1932 = vmatprep.mubr.msk.f32.mxu1 %vm193_vm0, %v1631_v41 }
  0x56   : > { %1949 = vmatmul.mubr.msk.f32.gmra.mxu0 %vm193_vm0, %v1703_v47 }
  0x57   : > { %1933 = vmatmul.mubr.msk.f32.gmra.mxu1 %vm193_vm0, %v1685_v46 }
  0xd2   : > { %v1813_v48 = vpop.f32.mrf.mxu0 }
  0xd3   : > { %v1819_v49 = vpop.f32.mrf.mxu1 }
  0xd4   : > { %v284_v50 = vpop.f32.mrf.mxu0 }
  0xd5   : > { %v304_v51 = vpop.f32.mrf.mxu1 }
  0xd6   : > { %v1816_v52 = vpop.f32.mrf.mxu0 }
  0xd7   : > { %v1822_v53 = vpop.f32.mrf.mxu1 }
  0xd8   : > { %v294_v54 = vpop.f32.mrf.mxu0 }
  0xd9   : > { %v2248_v55 = vpop.f32.mrf.mxu1 }
  0xda   : > { %v1845_v57 = vpop.f32.mrf.mxu0 }
  0xdb   : > { %v1829_v56 = vpop.f32.mrf.mxu1 }
  0xdc   : > { %v553_v59 = vpop.f32.mrf.mxu0  ;;  %v419_v24 = vadd.f32 %v1829_v56, %v1813_v48 }
  0xdd   : > { %v413_v58 = vpop.f32.mrf.mxu1 }
  0xde   : > { %v1848_v61 = vpop.f32.mrf.mxu0  ;;  %v414_v27 = vadd.f32 %v413_v58, %v284_v50  ;;  %v593_v30 = vadd.f32 %v1845_v57, %v419_v24 }
  0xdf   : > { %v1832_v60 = vpop.f32.mrf.mxu1 }
  0xe0   : > { %v563_v63 = vpop.f32.mrf.mxu0  ;;  %v429_v31 = vadd.f32 %v1832_v60, %v1816_v52  ;;  %v592_v34 = vadd.f32 %v553_v59, %v414_v27 }
  0xe1   : > { %v423_v62 = vpop.f32.mrf.mxu1 }
  0xe2   : > { %v1851_v1 = vpop.f32.mrf.mxu0  ;;  %v424_v35 = vadd.f32 %v423_v62, %v294_v54  ;;  %v595_v40 = vadd.f32 %v1848_v61, %v429_v31 }
  0xe3   : > { %v1835_v0 = vpop.f32.mrf.mxu1 }
  0xe4   : > { %v573_v3 = vpop.f32.mrf.mxu0  ;;  %v439_v37 = vadd.f32 %v1835_v0, %v1819_v49  ;;  %v594_v45 = vadd.f32 %v563_v63, %v424_v35 }
  0xe5   : > { %v433_v2 = vpop.f32.mrf.mxu1 }
  0xe6   : > { %v1854_v5 = vpop.f32.mrf.mxu0  ;;  %v434_v42 = vadd.f32 %v433_v2, %v304_v51  ;;  %v597_v48 = vadd.f32 %v1851_v1, %v439_v37 }
  0xe7   : > { %v1838_v4 = vpop.f32.mrf.mxu1 }
  0xe8   : > { %v2250_v7 = vpop.f32.mrf.mxu0  ;;  %v449_v50 = vadd.f32 %v1838_v4, %v1822_v53  ;;  %v596_v58 = vadd.f32 %v573_v3, %v434_v42 }
  0xe9   : > { %v443_v6 = vpop.f32.mrf.mxu1 }
  0xea   : > { %v1877_v9 = vpop.f32.mrf.mxu0  ;;  %v444_v51 = vadd.f32 %v443_v6, %v2248_v55  ;;  %v599_v0 = vadd.f32 %v1854_v5, %v449_v50  ;;  %v1714_v5 = vld [vmem:[%s2299_s2] ss:$0 sm:$0xff] }
  0xeb   : > { %v1861_v8 = vpop.f32.mrf.mxu1 }
  0xec   : > { %v850_v11 = vpop.f32.mrf.mxu0  ;;  %v742_v36 = vadd.f32 %v1861_v8, %v593_v30  ;;  %v598_v3 = vadd.f32 %v2250_v7, %v444_v51 }
  0xed   : > { %v702_v10 = vpop.f32.mrf.mxu1 }
  0xee   : > { %v1880_v13 = vpop.f32.mrf.mxu0  ;;  %v741_v41 = vadd.f32 %v702_v10, %v592_v34  ;;  %v890_v46 = vadd.f32 %v1877_v9, %v742_v36 }
  0xef   : > { %v1864_v12 = vpop.f32.mrf.mxu1 }
  0xf0   : > { %v860_v15 = vpop.f32.mrf.mxu0  ;;  %v744_v47 = vadd.f32 %v1864_v12, %v595_v40  ;;  %v889_v54 = vadd.f32 %v850_v11, %v741_v41 }
  0xf1   : > { %v712_v14 = vpop.f32.mrf.mxu1 }
  0xf2   : > { %v1883_v17 = vpop.f32.mrf.mxu0  ;;  %v743_v56 = vadd.f32 %v712_v14, %v594_v45  ;;  %v892_v62 = vadd.f32 %v1880_v13, %v744_v47 }
  0xf3   : > { %v1867_v16 = vpop.f32.mrf.mxu1 }
  0xf4   : > { %v870_v19 = vpop.f32.mrf.mxu0  ;;  %v746_v59 = vadd.f32 %v1867_v16, %v597_v48  ;;  %v891_v4 = vadd.f32 %v860_v15, %v743_v56 }
  0xf5   : > { %v722_v18 = vpop.f32.mrf.mxu1 }
  0xf6   : > { %v2252_v21 = vpop.f32.mrf.mxu0  ;;  %v745_v1 = vadd.f32 %v722_v18, %v596_v58  ;;  %v894_v10 = vadd.f32 %v1883_v17, %v746_v59 }
  0xf7   : > { %v1870_v20 = vpop.f32.mrf.mxu1 }
  0xf8   : > { %v2254_v23 = vpop.f32.mrf.mxu0  ;;  %v748_v55 = vadd.f32 %v1870_v20, %v599_v0  ;;  %v893_v16 = vadd.f32 %v870_v19, %v745_v1 }
  0xf9   : > { %v732_v22 = vpop.f32.mrf.mxu1 }
  0xfa   : > { %v1909_v26 = vpop.f32.mrf.mxu0  ;;  %v747_v24 = vadd.f32 %v732_v22, %v598_v3  ;;  %v896_v17 = vadd.f32 %v2252_v21, %v748_v55 }
  0xfb   : > { %v1893_v25 = vpop.f32.mrf.mxu1 }
  0xfc   : > { %v1147_v29 = vpop.f32.mrf.mxu0  ;;  %v1038_v57 = vadd.f32 %v1893_v25, %v890_v46 }
  0xfd   : > { %v998_v28 = vpop.f32.mrf.mxu1 }
  0xfe   : > { %v1912_v33 = vpop.f32.mrf.mxu0  ;;  %v1037_v63 = vadd.f32 %v998_v28, %v889_v54  ;;  %v1187_v8 = vadd.f32 %v1909_v26, %v1038_v57 }
  0xff   : > { %v1896_v32 = vpop.f32.mrf.mxu1 }
 0x100   : > { %v1157_v39 = vpop.f32.mrf.mxu0  ;;  %v1040_v9 = vadd.f32 %v1896_v32, %v892_v62  ;;  %v1186_v12 = vadd.f32 %v1147_v29, %v1037_v63  ;;  %v895_v32 = vadd.f32 %v2254_v23, %v747_v24 }
 0x101   : > { %v1008_v38 = vpop.f32.mrf.mxu1 }
 0x102   : > { %v1915_v44 = vpop.f32.mrf.mxu0  ;;  %v1039_v13 = vadd.f32 %v1008_v38, %v891_v4  ;;  %v1189_v26 = vadd.f32 %v1912_v33, %v1040_v9 }
 0x103   : > { %v1899_v43 = vpop.f32.mrf.mxu1 }
 0x104   : > { %v1167_v49 = vpop.f32.mrf.mxu0  ;;  %v1042_v25 = vadd.f32 %v1899_v43, %v894_v10  ;;  %v1188_v28 = vadd.f32 %v1157_v39, %v1039_v13 }
 0x105   : > { %v1018_v52 = vpop.f32.mrf.mxu1 }
 0x106   : > { %v1918_v61 = vpop.f32.mrf.mxu0  ;;  %v1041_v20 = vadd.f32 %v1018_v52, %v893_v16  ;;  %v1191_v33 = vadd.f32 %v1915_v44, %v1042_v25 }
 0x107   : > { %v1902_v60 = vpop.f32.mrf.mxu1 }
 0x108   : > { %v1177_v2 = vpop.f32.mrf.mxu0  ;;  %v1044_v35 = vadd.f32 %v1902_v60, %v896_v17  ;;  %v1190_v40 = vadd.f32 %v1167_v49, %v1041_v20 }
 0x109   : > { %v1028_v53 = vpop.f32.mrf.mxu1 }
 0x10a   : > { %v1941_v11 = vpop.f32.mrf.mxu0  ;;  %v1043_v39 = vadd.f32 %v1028_v53, %v895_v32  ;;  %v1193_v47 = vadd.f32 %v1918_v61, %v1044_v35 }
 0x10b   : > { %v1925_v6 = vpop.f32.mrf.mxu1 }
 0x10c   : > { %v1335_v14 = vadd.f32 %v1925_v6, %v1187_v8  ;;  %v1443_v18 = vpop.f32.mrf.mxu0  ;;  %v1192_v56 = vadd.f32 %v1177_v2, %v1043_v39 }
 0x10d   : > { %v1295_v15 = vpop.f32.mrf.mxu1 }
 0x10e   : > { %v1483_v27 = vadd.f32 %v1941_v11, %v1335_v14  ;;  %v1334_v7 = vadd.f32 %v1295_v15, %v1186_v12  ;;  %v1944_v22 = vpop.f32.mrf.mxu0 }
 0x10f   : > { %v1928_v19 = vpop.f32.mrf.mxu1 }
 0x110   : > { %v1498_v29 = vadd.f32 %v1714_v5, %v1483_v27  ;;  %v1482_v30 = vadd.f32 %v1443_v18, %v1334_v7  ;;  %v1337_v31 = vadd.f32 %v1928_v19, %v1189_v26  ;;  %v1453_v21 = vpop.f32.mrf.mxu0 }
 0x111   : > { %v1305_v34 = vpop.f32.mrf.mxu1 }
 0x112   : > { %1507 = vst.msk [vmem:[%s2275_s9 + $0x8] sm:$0xff] %vm1505_vm1, %v1498_v29  ;;  %v1497_v36 = vadd.f32 %v1714_v5, %v1482_v30  ;;  %v1485_v37 = vadd.f32 %v1944_v22, %v1337_v31  ;;  %v1336_v38 = vadd.f32 %v1305_v34, %v1188_v28  ;;  %v1947_v42 = vpop.f32.mrf.mxu0 }
 0x113   : > { %v1931_v41 = vpop.f32.mrf.mxu1 }
 0x114   : > { %1506 = vst.msk [vmem:[%s2275_s9] sm:$0xff] %vm1505_vm1, %v1497_v36  ;;  %v1500_v43 = vadd.f32 %v1714_v5, %v1485_v37  ;;  %v1484_v45 = vadd.f32 %v1453_v21, %v1336_v38  ;;  %v1339_v23 = vadd.f32 %v1931_v41, %v1191_v33  ;;  %v1463_v46 = vpop.f32.mrf.mxu0 }
 0x115   : > { %v1315_v44 = vpop.f32.mrf.mxu1 }
 0x116   : > { %1509 = vst.msk [vmem:[%s2275_s9 + $0x18] sm:$0xff] %vm1505_vm1, %v1500_v43  ;;  %v1499_v48 = vadd.f32 %v1714_v5, %v1484_v45  ;;  %v1487_v50 = vadd.f32 %v1947_v42, %v1339_v23  ;;  %v1338_v52 = vadd.f32 %v1315_v44, %v1190_v40  ;;  %v1950_v54 = vpop.f32.mrf.mxu0 }
 0x117   : > { %v1934_v49 = vpop.f32.mrf.mxu1 }
 0x118   : > { %1508 = vst.msk [vmem:[%s2275_s9 + $0x10] sm:$0xff] %vm1505_vm1, %v1499_v48  ;;  %v1502_v57 = vadd.f32 %v1714_v5, %v1487_v50  ;;  %v1486_v58 = vadd.f32 %v1463_v46, %v1338_v52  ;;  %v1341_v51 = vadd.f32 %v1934_v49, %v1193_v47  ;;  %v1473_v63 = vpop.f32.mrf.mxu0 }
 0x119   : > { %v1325_v59 = vpop.f32.mrf.mxu1 }
 0x11a   : > { %1511 = vst.msk [vmem:[%s2275_s9 + $0x28] sm:$0xff] %vm1505_vm1, %v1502_v57  ;;  %v1501_v60 = vadd.f32 %v1714_v5, %v1486_v58  ;;  %v1489_v61 = vadd.f32 %v1950_v54, %v1341_v51  ;;  %v1340_v62 = vadd.f32 %v1325_v59, %v1192_v56 }
 0x11c   : > { %1510 = vst.msk [vmem:[%s2275_s9 + $0x20] sm:$0xff] %vm1505_vm1, %v1501_v60  ;;  %v1504_v0 = vadd.f32 %v1714_v5, %v1489_v61  ;;  %v1488_v1 = vadd.f32 %v1473_v63, %v1340_v62 }
 0x11e   : > { %1513 = vst.msk [vmem:[%s2275_s9 + $0x38] sm:$0xff] %vm1505_vm1, %v1504_v0  ;;  %v1503_v53 = vadd.f32 %v1714_v5, %v1488_v1 }
 0x120   : > { %1512 = vst.msk [vmem:[%s2275_s9 + $0x30] sm:$0xff] %vm1505_vm1, %v1503_v53 }
 0x121 PF: > { %s13_s12 = sadd.s32 1, %s1970_s12  }
 0x122   : > { %p10_p5 = scmp.ge.s32.totalorder %s13_s12, 4  }
 0x124   :  { %12 = sbr.rel (!%p10_p5) target bundleno = 1 (0x1), region = 72 }

</bundles_post_ra>
